<compile_context>
chip_gen: v7x
topology: tpu7x:2x2x1
jax: 0.10.0
libtpu: 0.0.40
codegen_flags: <defaults>
</compile_context>

<pallas_src>
import functools
import math

import jax
import jax.numpy as jnp
from jax import lax
from jax.experimental import pallas as pl
from jax.experimental.pallas import tpu as pltpu


# ----------------------------- helpers -------------------------------------- #

def _choose_tile(dim, pref, granule):
    """Largest tile <= pref that evenly divides `dim` and is a multiple of
    `granule`; falls back to the full extent (full-extent blocks waive the
    (8,128) divisibility rule), so no padding is ever required."""
    if dim <= pref:
        return dim
    t = (pref // granule) * granule
    while t >= granule:
        if dim % t == 0:
            return t
        t -= granule
    return dim


def _vmem_limit_bytes(working_set_bytes):
    """Generation-aware VMEM cap (v5e/v6e 128 MiB, v7x 64 MiB physical)."""
    try:
        cap = pltpu.get_tpu_info().vmem_capacity_bytes
    except Exception:  # unknown / interpret environments
        cap = 64 << 20
    cap = (3 * cap) // 4                       # headroom for compiler scratch
    return int(min(cap, max(4 * working_set_bytes, 16 << 20)))


# ----------------------------- kernels -------------------------------------- #

def _noisy_train_kernel(x_ref, wmu_ref, wsig_ref, eps_out_ref, eps_in_ref,
                        bmu_ref, bsig_ref, beps_ref, o_ref, acc_ref,
                        *, compute_dtype):
    k = pl.program_id(2)

    @pl.when(k == 0)
    def _():
        acc_ref[...] = jnp.zeros_like(acc_ref)

    # Rank-1 factored noise: epsilon tile = eps_out[:, :1] * eps_in[:1, :].
    # Combine in f32 on the VPU (v5e has no bf16 VALU); weights may be bf16.
    eps = (eps_out_ref[...].astype(jnp.float32)      # (tn, 1)
           * eps_in_ref[...].astype(jnp.float32))    # (1, tk) -> (tn, tk)
    w = wmu_ref[...].astype(jnp.float32) + wsig_ref[...].astype(jnp.float32) * eps

    mxu_dtype = jnp.float32 if compute_dtype is None else compute_dtype
    x = x_ref[...].astype(mxu_dtype)
    w = w.astype(mxu_dtype)

    # Contract the last dim of both operands directly -> MXU, no transpose.
    acc_ref[...] += lax.dot_general(
        x, w, dimension_numbers=(((1,), (1,)), ((), ())),
        preferred_element_type=jnp.float32)

    @pl.when(k == pl.num_programs(2) - 1)
    def _():
        b = (bmu_ref[...].astype(jnp.float32)
             + bsig_ref[...].astype(jnp.float32) * beps_ref[...].astype(jnp.float32))
        o_ref[...] = (acc_ref[...] + b).astype(o_ref.dtype)


def _linear_eval_kernel(x_ref, wmu_ref, bmu_ref, o_ref, acc_ref,
                        *, compute_dtype):
    k = pl.program_id(2)

    @pl.when(k == 0)
    def _():
        acc_ref[...] = jnp.zeros_like(acc_ref)

    mxu_dtype = jnp.float32 if compute_dtype is None else compute_dtype
    x = x_ref[...].astype(mxu_dtype)
    w = wmu_ref[...].astype(mxu_dtype)

    acc_ref[...] += lax.dot_general(
        x, w, dimension_numbers=(((1,), (1,)), ((), ())),
        preferred_element_type=jnp.float32)

    @pl.when(k == pl.num_programs(2) - 1)
    def _():
        o_ref[...] = (acc_ref[...] + bmu_ref[...].astype(jnp.float32)
                      ).astype(o_ref.dtype)


# ----------------------------- wrapper --------------------------------------- #

def noisy_linear(x, weight_mu, weight_sigma, eps_out, eps_in,
                 bias_mu, bias_sigma, bias_epsilon, *, training=True,
                 tm=512, tn=256, tk=1024, compute_dtype=None):
    """Pallas implementation of NoisyLinear.forward.

    x: (B, K); weight_*: (N, K); eps_out: (N,); eps_in: (K,); bias_*: (N,).
    Returns (B, N).  `weight_epsilon` is the rank-1 outer(eps_out, eps_in), so
    only the two vectors are streamed.  compute_dtype optionally feeds the MXU
    in bf16 (noise combine and accumulation stay f32) -- only matters once the
    batch makes this compute-bound.
    """
    B, K = x.shape
    N, K2 = weight_mu.shape
    assert K == K2, (K, K2)

    # Tile selection: no padding.  Whole batch in one i block when it fits
    # (weights are streamed exactly once from HBM); tn lane-dense (x128) or
    # full-extent; tk a multiple of 128 or full-extent.
    tm = _choose_tile(B, tm, 8)
    tn = _choose_tile(N, tn, 128)
    tk = _choose_tile(K, tk, 128)

    gi, gj = B // tm, N // tn
    # v7x has 2 TensorCores: give the parallel axes >= 2 steps when possible.
    if gi * gj == 1 and tn % 256 == 0:
        tn //= 2
        gj = N // tn
    gk = K // tk
    grid = (gi, gj, gk)

    # Tiny 2-D views of the vectors (no N*K materialization, no padding).
    eps_out2 = eps_out.reshape(N, 1)
    eps_in2 = eps_in.reshape(1, K)
    bmu2 = bias_mu.reshape(1, N)
    bsig2 = bias_sigma.reshape(1, N)
    beps2 = bias_epsilon.reshape(1, N)

    x_spec = pl.BlockSpec((tm, tk), lambda i, j, k: (i, k))
    w_spec = pl.BlockSpec((tn, tk), lambda i, j, k: (j, k))
    eo_spec = pl.BlockSpec((tn, 1), lambda i, j, k: (j, 0))
    ei_spec = pl.BlockSpec((1, tk), lambda i, j, k: (0, k))
    b_spec = pl.BlockSpec((1, tn), lambda i, j, k: (0, j))
    o_spec = pl.BlockSpec((tm, tn), lambda i, j, k: (i, j))

    if training:
        kernel = functools.partial(_noisy_train_kernel,
                                   compute_dtype=compute_dtype)
        inputs = (x, weight_mu, weight_sigma, eps_out2, eps_in2,
                  bmu2, bsig2, beps2)
        in_specs = [x_spec, w_spec, w_spec, eo_spec, ei_spec,
                    b_spec, b_spec, b_spec]
        n_w = 2
    else:
        # Eval ignores the noise entirely: skip sigma/epsilon HBM streams.
        kernel = functools.partial(_linear_eval_kernel,
                                   compute_dtype=compute_dtype)
        inputs = (x, weight_mu, bmu2)
        in_specs = [x_spec, w_spec, b_spec]
        n_w = 1

    w_bytes = jnp.dtype(weight_mu.dtype).itemsize
    x_bytes = jnp.dtype(x.dtype).itemsize

    cost = pl.CostEstimate(
        flops=2 * B * N * K,
        transcendentals=0,
        bytes_accessed=(gi * n_w * N * K * w_bytes          # weights per i block
                        + gj * B * K * x_bytes               # x per j block
                        + B * N * x_bytes                    # output
                        + 4 * (N + K) * 4))                  # vectors

    # Double-buffered input tiles + output + f32 accumulator (+ small vectors).
    working_set = (2 * (tm * tk * x_bytes + n_w * tn * tk * w_bytes)
                   + 2 * tm * tn * x_bytes + tm * tn * 4
                   + 2 * (tn * 128 + tk * 4 + 3 * tn) * 4)
    vmem_limit = _vmem_limit_bytes(working_set)

    return pl.pallas_call(
        kernel,
        out_shape=jax.ShapeDtypeStruct((B, N), x.dtype),
        grid_spec=pltpu.PrefetchScalarGridSpec(
            num_scalar_prefetch=0,
            grid=grid,
            in_specs=in_specs,
            out_specs=o_spec,
            scratch_shapes=[pltpu.VMEM((tm, tn), jnp.float32)]),
        compiler_params=pltpu.CompilerParams(
            dimension_semantics=("parallel", "parallel", "arbitrary"),
            vmem_limit_bytes=vmem_limit),
        cost_estimate=cost,
    )(*inputs)


# ----------------------------- init (mirrors PyTorch) ------------------------ #

def _scale_noise(key, size):
    # PyTorch: x = randn(size); x.sign() * x.abs().sqrt()
    x = jax.random.normal(key, (size,), dtype=jnp.float32)
    return jnp.sign(x) * jnp.sqrt(jnp.abs(x))


def init_noisy_linear(key, in_features, out_features, std_init=0.4,
                      weights_dtype=jnp.float32):
    """Parameter/noise init.  Set weights_dtype=jnp.bfloat16 to store the two
    dominant N*K streams in bf16 once here (NOT per forward call); biases and
    the factored noise vectors stay f32."""
    k_wmu, k_bmu, k_ein, k_eout, k_beps = jax.random.split(key, 5)
    mu_range = 1.0 / math.sqrt(in_features)

    weight_mu = jax.random.uniform(k_wmu, (out_features, in_features),
                                   minval=-mu_range, maxval=mu_range,
                                   dtype=jnp.float32).astype(weights_dtype)
    weight_sigma = jnp.full((out_features, in_features),
                            std_init / math.sqrt(in_features), weights_dtype)
    bias_mu = jax.random.uniform(k_bmu, (out_features,),
                                 minval=-mu_range, maxval=mu_range,
                                 dtype=jnp.float32)
    bias_sigma = jnp.full((out_features,),
                          std_init / math.sqrt(out_features), jnp.float32)

    eps_in = _scale_noise(k_ein, in_features)
    eps_out = _scale_noise(k_eout, out_features)
    bias_epsilon = _scale_noise(k_beps, out_features)

    return dict(weight_mu=weight_mu, weight_sigma=weight_sigma,
                eps_in=eps_in, eps_out=eps_out,
                weight_epsilon=jnp.outer(eps_out, eps_in),  # reference only
                bias_mu=bias_mu, bias_sigma=bias_sigma,
                bias_epsilon=bias_epsilon)


# ----------------------------- demo / checks --------------------------------- #

def _reference(x, p, training):
    if training:
        w = (p["weight_mu"].astype(jnp.float32)
             + p["weight_sigma"].astype(jnp.float32) * p["weight_epsilon"])
        b = p["bias_mu"] + p["bias_sigma"] * p["bias_epsilon"]
    else:
        w, b = p["weight_mu"].astype(jnp.float32), p["bias_mu"]
    return x @ w.T + b


def _run(x, p, **kw):
    return jax.block_until_ready(noisy_linear(
        x, p["weight_mu"], p["weight_sigma"], p["eps_out"], p["eps_in"],
        p["bias_mu"], p["bias_sigma"], p["bias_epsilon"], **kw))


if __name__ == "__main__":
    key = jax.random.PRNGKey(0)
    k_p1, k_p2, k_x1, k_x2 = jax.random.split(key, 4)

    # --- module-sized demo (tiny NoisyLinear head, no padding, 1 grid step) -- #
    batch, in_features, out_features = 8, 32, 32
    params = init_noisy_linear(k_p1, in_features, out_features, std_init=0.4)
    x = jax.random.normal(k_x1, (batch, in_features), dtype=jnp.float32)

    out = _run(x, params, training=True)
    assert out.shape == (batch, out_features)
    assert jnp.allclose(out, _reference(x, params, True), atol=1e-5, rtol=1e-5)

    out_eval = _run(x, params, training=False)
    assert jnp.allclose(out_eval, _reference(x, params, False),
                        atol=1e-5, rtol=1e-5)

    # --- multi-tile grid (exercise i/j parallel axes + k accumulation) ------- #
    B2, K2, N2 = 16, 256, 256
    params2 = init_noisy_linear(k_p2, K2, N2, std_init=0.4)
    x2 = jax.random.normal(k_x2, (B2, K2), dtype=jnp.float32)

    out2 = _run(x2, params2, training=True, tm=8, tn=128, tk=128)
    assert jnp.allclose(out2, _reference(x2, params2, True),
                        atol=1e-4, rtol=1e-4)

    # --- bf16-stored weights + bf16 MXU feed (f32 combine/accumulate) -------- #
    params3 = init_noisy_linear(k_p2, K2, N2, std_init=0.4,
                                weights_dtype=jnp.bfloat16)
    out3 = _run(x2, params3, training=True, tm=8, tn=128, tk=128,
                compute_dtype=jnp.bfloat16)
    assert jnp.allclose(out3, _reference(x2, params3, True),
                        atol=5e-2, rtol=5e-2)

    print("KERNEL_OK")
</pallas_src>

<mosaic_0001>
module attributes {stable_mosaic.version = 11 : i64} {
  func.func @_noisy_train_kernel(%arg0: i32, %arg1: i32, %arg2: i32, %arg3: memref<8x32xf32, #tpu.memory_space<vmem>>, %arg4: memref<32x32xf32, #tpu.memory_space<vmem>>, %arg5: memref<32x32xf32, #tpu.memory_space<vmem>>, %arg6: memref<32x1xf32, #tpu.memory_space<vmem>>, %arg7: memref<1x32xf32, #tpu.memory_space<vmem>>, %arg8: memref<1x32xf32, #tpu.memory_space<vmem>>, %arg9: memref<1x32xf32, #tpu.memory_space<vmem>>, %arg10: memref<1x32xf32, #tpu.memory_space<vmem>>, %arg11: memref<8x32xf32, #tpu.memory_space<vmem>>, %arg12: memref<8x32xf32, #tpu.memory_space<vmem>>) attributes {dimension_semantics = [#tpu.dimension_semantics<parallel>, #tpu.dimension_semantics<parallel>, #tpu.dimension_semantics<arbitrary>], iteration_bounds = array<i64: 1, 1, 1>, scalar_prefetch = 0 : i64, scratch_operands = 1 : i64, tpu.core_type = #tpu.core_type<tc>, window_params = [{transform_indices = @transform_0, window_bounds = array<i64: 8, 32>}, {transform_indices = @transform_1, window_bounds = array<i64: 32, 32>}, {transform_indices = @transform_2, window_bounds = array<i64: 32, 32>}, {transform_indices = @transform_3, window_bounds = array<i64: 32, 1>}, {transform_indices = @transform_4, window_bounds = array<i64: 1, 32>}, {transform_indices = @transform_5, window_bounds = array<i64: 1, 32>}, {transform_indices = @transform_6, window_bounds = array<i64: 1, 32>}, {transform_indices = @transform_7, window_bounds = array<i64: 1, 32>}, {transform_indices = @transform_8, window_bounds = array<i64: 8, 32>}]} {
    %c0_i32 = arith.constant 0 : i32
    %0 = arith.cmpi eq, %arg2, %c0_i32 : i32
    %1 = arith.extui %0 : i1 to i32
    %c0_i32_0 = arith.constant 0 : i32
    %2 = arith.cmpi ne, %1, %c0_i32_0 : i32
    scf.if %2 {
      %cst_16 = arith.constant 0.000000e+00 : f32
      %20 = vector.broadcast %cst_16 : f32 to vector<8x32xf32>
      %c0_17 = arith.constant 0 : index
      %c0_18 = arith.constant 0 : index
      %21 = vector.load %arg12[%c0_17, %c0_18] : memref<8x32xf32, #tpu.memory_space<vmem>>, vector<8x32xf32>
      tpu.vector_store %arg12[%c0_17, %c0_18], %20 {strides = array<i32>} : memref<8x32xf32, #tpu.memory_space<vmem>>, vector<8x32xf32>,
    } else {
    }
    %c0 = arith.constant 0 : index
    %c0_1 = arith.constant 0 : index
    %3 = vector.load %arg6[%c0, %c0_1] : memref<32x1xf32, #tpu.memory_space<vmem>>, vector<32x1xf32>
    %c0_2 = arith.constant 0 : index
    %c0_3 = arith.constant 0 : index
    %4 = vector.load %arg7[%c0_2, %c0_3] : memref<1x32xf32, #tpu.memory_space<vmem>>, vector<1x32xf32>
    %5 = vector.broadcast %3 : vector<32x1xf32> to vector<32x32xf32>
    %6 = vector.broadcast %4 : vector<1x32xf32> to vector<32x32xf32>
    %7 = arith.mulf %5, %6 : vector<32x32xf32>
    %c0_4 = arith.constant 0 : index
    %c0_5 = arith.constant 0 : index
    %8 = vector.load %arg4[%c0_4, %c0_5] : memref<32x32xf32, #tpu.memory_space<vmem>>, vector<32x32xf32>
    %c0_6 = arith.constant 0 : index
    %c0_7 = arith.constant 0 : index
    %9 = vector.load %arg5[%c0_6, %c0_7] : memref<32x32xf32, #tpu.memory_space<vmem>>, vector<32x32xf32>
    %10 = arith.mulf %9, %7 : vector<32x32xf32>
    %11 = arith.addf %8, %10 : vector<32x32xf32>
    %c0_8 = arith.constant 0 : index
    %c0_9 = arith.constant 0 : index
    %12 = vector.load %arg3[%c0_8, %c0_9] : memref<8x32xf32, #tpu.memory_space<vmem>>, vector<8x32xf32>
    %c0_10 = arith.constant 0 : index
    %c0_11 = arith.constant 0 : index
    %13 = vector.load %arg12[%c0_10, %c0_11] : memref<8x32xf32, #tpu.memory_space<vmem>>, vector<8x32xf32>
    %cst = arith.constant dense<0.000000e+00> : vector<8x32xf32>
    %14 = tpu.matmul %12, %11, %cst {dimension_numbers = #tpu.dot_dimension_numbers<[1], [1], [0], [0], [0, 0, 1, 0], [], []>} : vector<8x32xf32>, vector<32x32xf32>, vector<8x32xf32> -> vector<8x32xf32>
    %15 = arith.addf %13, %14 : vector<8x32xf32>
    %c0_12 = arith.constant 0 : index
    %c0_13 = arith.constant 0 : index
    %16 = vector.load %arg12[%c0_12, %c0_13] : memref<8x32xf32, #tpu.memory_space<vmem>>, vector<8x32xf32>
    tpu.vector_store %arg12[%c0_12, %c0_13], %15 {strides = array<i32>} : memref<8x32xf32, #tpu.memory_space<vmem>>, vector<8x32xf32>,
    %c0_i32_14 = arith.constant 0 : i32
    %17 = arith.cmpi eq, %arg2, %c0_i32_14 : i32
    %18 = arith.extui %17 : i1 to i32
    %c0_i32_15 = arith.constant 0 : i32
    %19 = arith.cmpi ne, %18, %c0_i32_15 : i32
    scf.if %19 {
      %c0_16 = arith.constant 0 : index
      %c0_17 = arith.constant 0 : index
      %20 = vector.load %arg8[%c0_16, %c0_17] : memref<1x32xf32, #tpu.memory_space<vmem>>, vector<1x32xf32>
      %c0_18 = arith.constant 0 : index
      %c0_19 = arith.constant 0 : index
      %21 = vector.load %arg9[%c0_18, %c0_19] : memref<1x32xf32, #tpu.memory_space<vmem>>, vector<1x32xf32>
      %c0_20 = arith.constant 0 : index
      %c0_21 = arith.constant 0 : index
      %22 = vector.load %arg10[%c0_20, %c0_21] : memref<1x32xf32, #tpu.memory_space<vmem>>, vector<1x32xf32>
      %23 = arith.mulf %21, %22 : vector<1x32xf32>
      %24 = arith.addf %20, %23 : vector<1x32xf32>
      %c0_22 = arith.constant 0 : index
      %c0_23 = arith.constant 0 : index
      %25 = vector.load %arg12[%c0_22, %c0_23] : memref<8x32xf32, #tpu.memory_space<vmem>>, vector<8x32xf32>
      %26 = vector.broadcast %24 : vector<1x32xf32> to vector<8x32xf32>
      %27 = arith.addf %25, %26 : vector<8x32xf32>
      %c0_24 = arith.constant 0 : index
      %c0_25 = arith.constant 0 : index
      %28 = vector.load %arg11[%c0_24, %c0_25] : memref<8x32xf32, #tpu.memory_space<vmem>>, vector<8x32xf32>
      tpu.vector_store %arg11[%c0_24, %c0_25], %27 {strides = array<i32>} : memref<8x32xf32, #tpu.memory_space<vmem>>, vector<8x32xf32>,
    } else {
    }
    return
  }
  func.func @transform_0(%arg0: i32, %arg1: i32, %arg2: i32) -> (i32, i32) {
    %c0_i32 = arith.constant 0 : i32
    return %arg0, %arg2 : i32, i32
  }
  func.func @transform_1(%arg0: i32, %arg1: i32, %arg2: i32) -> (i32, i32) {
    %c0_i32 = arith.constant 0 : i32
    return %arg1, %arg2 : i32, i32
  }
  func.func @transform_2(%arg0: i32, %arg1: i32, %arg2: i32) -> (i32, i32) {
    %c0_i32 = arith.constant 0 : i32
    return %arg1, %arg2 : i32, i32
  }
  func.func @transform_3(%arg0: i32, %arg1: i32, %arg2: i32) -> (i32, i32) {
    %c0_i32 = arith.constant 0 : i32
    %c0_i32_0 = arith.constant 0 : i32
    return %arg1, %c0_i32 : i32, i32
  }
  func.func @transform_4(%arg0: i32, %arg1: i32, %arg2: i32) -> (i32, i32) {
    %c0_i32 = arith.constant 0 : i32
    %c0_i32_0 = arith.constant 0 : i32
    return %c0_i32, %arg2 : i32, i32
  }
  func.func @transform_5(%arg0: i32, %arg1: i32, %arg2: i32) -> (i32, i32) {
    %c0_i32 = arith.constant 0 : i32
    %c0_i32_0 = arith.constant 0 : i32
    return %c0_i32, %arg1 : i32, i32
  }
  func.func @transform_6(%arg0: i32, %arg1: i32, %arg2: i32) -> (i32, i32) {
    %c0_i32 = arith.constant 0 : i32
    %c0_i32_0 = arith.constant 0 : i32
    return %c0_i32, %arg1 : i32, i32
  }
  func.func @transform_7(%arg0: i32, %arg1: i32, %arg2: i32) -> (i32, i32) {
    %c0_i32 = arith.constant 0 : i32
    %c0_i32_0 = arith.constant 0 : i32
    return %c0_i32, %arg1 : i32, i32
  }
  func.func @transform_8(%arg0: i32, %arg1: i32, %arg2: i32) -> (i32, i32) {
    %c0_i32 = arith.constant 0 : i32
    return %arg0, %arg1 : i32, i32
  }
}

</mosaic_0001>

<bundles_post_ra>
// kernel: tpu_custom_call.1
= control target key start
LH: loop header
LB: loop body
LE: loop exit
PB: predicated region body
PF: predicated region fallthrough
CT: control target
= control target key end

     0   :  { %13 = vsyncpa [#allocation4], 0  ;;  %s488_s0 = inlined_call_operand.hbm [shape: f32[8,32], index: 0, kind: input, shape index: {}]   ;;  %s489_s1 = inlined_call_operand.vmem [shape: f32[32,32], index: 1, kind: input, shape index: {}]   ;;  %s490_s2 = inlined_call_operand.hbm [shape: f32[32,32], index: 2, kind: input, shape index: {}]   ;;  %s491_s3 = inlined_call_operand.vmem [shape: f32[32,1], index: 3, kind: input, shape index: {}]   ;;  %s492_s4 = inlined_call_operand.vmem [shape: f32[1,32], index: 4, kind: input, shape index: {}]   ;;  %s493_s5 = inlined_call_operand.vmem [shape: f32[1,32], index: 5, kind: input, shape index: {}]   ;;  %s494_s6 = inlined_call_operand.vmem [shape: f32[1,32], index: 6, kind: input, shape index: {}]   ;;  %s495_s7 = inlined_call_operand.vmem [shape: f32[1,32], index: 7, kind: input, shape index: {}]   ;;  %s496_s8 = inlined_call_operand.hbm [shape: f32[8,32], index: 8, kind: output, shape index: {}]  }
   0x1   :  { %14 = vsyncpa [#allocation7], 0 }
   0x2   :  { %15 = vsyncpa [#allocation5], 0  ;;  %s349_s27 = smov [#allocation3]   ;;  %s350_s29 = smov [#allocation6]  }
   0x3   :  { %s22_s28 = sshll.u32 %s349_s27, 4  ;;  %s33_s30 = sshll.u32 %s350_s29, 4  ;;  %s23_s28 = int_to_ptr.vmem [resolvable:$true] %s22_s28  ;;  %s403_s30 = int_to_ptr.vmem [resolvable:$true] %s33_s30 }
   0x4   :  { %s277_s11 = scalar_lea.hbm %s488_s0, 128 }
   0x5   :  { %p278_p0 = scmp.ne.s32.totalorder %s488_s0, %s277_s11  ;;  %p281_p1 = scmp.lt.u32.totalorder %s277_s11, %s488_s0 }
   0x7   :  { %p283_p2 = pnand %p281_p1, %p278_p0 }
   0x9   :  { %286 = shalt.err (!%p283_p2)
}
   0xa   :  { %s287_s16 = scalar_lea.vmem %s23_s28, 128  ;;  %p292_p4 = scmp.lt.s32.totalorder %s23_s28, %s23_s28 }
   0xb   :  { %p288_p3 = scmp.ne.s32.totalorder %s23_s28, %s287_s16  ;;  %p293_p5 = scmp.lt.s32.totalorder %s287_s16, %s287_s16 }
   0xd   :  { %p294_p6 = por %p293_p5, %p292_p4 }
   0xf   :  { %p295_p7 = pnand %p294_p6, %p288_p3 }
  0x11   :  { %298 = shalt.err (!%p295_p7)
}
  0x12   :  { %25 = dma.hbm_to_vmem [thread:$0]  %s488_s0, 128, %s23_s28, [#allocation4]  }
  0x13   :  { %s299_s21 = scalar_lea.hbm %s490_s2, 512 }
  0x14   :  { %p300_p8 = scmp.ne.s32.totalorder %s490_s2, %s299_s21  ;;  %p303_p9 = scmp.lt.u32.totalorder %s299_s21, %s490_s2 }
  0x16   :  { %p305_p10 = pnand %p303_p9, %p300_p8 }
  0x18   :  { %308 = shalt.err (!%p305_p10)
}
  0x19   :  { %s309_s26 = scalar_lea.vmem %s403_s30, 512  ;;  %p314_p12 = scmp.lt.s32.totalorder %s403_s30, %s403_s30 }
  0x1a   :  { %p310_p11 = scmp.ne.s32.totalorder %s403_s30, %s309_s26  ;;  %p315_p13 = scmp.lt.s32.totalorder %s309_s26, %s309_s26 }
  0x1c   :  { %p316_p0 = por %p315_p13, %p314_p12 }
  0x1e   :  { %p317_p1 = pnand %p316_p0, %p310_p11 }
  0x20   :  { %320 = shalt.err (!%p317_p1)
}
  0x21   :  { %s351_s0 = smov 128   ;;  %s352_s27 = smov 8  }
  0x22   :  { %39 = dma.hbm_to_vmem [thread:$0]  %s490_s2, 512, %s403_s30, [#allocation7], %s351_s0, %s351_s0, %s352_s27  }
  0x23   :  { %343 = dma.done.wait [#allocation4], 128  }
  0x24   :  { %344 = vsyncadd [#allocation4], 4294967168 }
  0x25   :  { %345 = dma.done.wait [#allocation7], 512  }
  0x26   :  { %346 = vsyncadd [#allocation7], 4294966784  ;;  %v353_v0 = vmov 0   ;;  %v62_v1 = vld [vmem:[%s491_s3] sm:$0xff]  ;;  %v64_v2 = vld [vmem:[%s491_s3 + $0x10] sm:$0xff]  ;;  %v354_v5 = vmov 0.0|0.0   ;;  %v213_v35 = vlaneseq }
  0x27   :  { %275 = vset.pattern.permute.xlu0 %v353_v0  ;;  %276 = vset.pattern.permute.xlu1 %v353_v0  ;;  %v63_v3 = vld [vmem:[%s491_s3 + $0x8] sm:$0xff]  ;;  %v65_v4 = vld [vmem:[%s491_s3 + $0x18] sm:$0xff]  ;;  %vm60_vm0 = vcmask 261120   ;;  %v355_v6 = vmov 0.0   ;;  %vm356_vm1 = vmmov 0   ;;  %v101_v11 = vld [vmem:[#allocation6] sm:$0xff] }
  0x28   :  { %69 = vperm.xlu0 %275, %v62_v1   ;;  %79 = vperm.xlu1 %276, %v64_v2   ;;  %61 = vst.msk [vmem:[#allocation2] sm:$0xff] %vm60_vm0, %v355_v6  ;;  %v236_v7 = vld [vmem:[%s492_s4] ss:$0 sm:$0xff]  ;;  %v102_v12 = vld [vmem:[#allocation6 + $0x8] sm:$0xff]  ;;  %v98_v18 = vld [vmem:[%s489_s1 + $0x8] sm:$0xff]  ;;  %v214_v40 = vshrl.u32 %v213_v35, 7 }
  0x29   :  { %258 = vmatprep.subr.bf16.mxu0 %v354_v5  ;;  %255 = vmatprep.mubr.msk.f32.mxu0 %vm356_vm1, %v355_v6  ;;  %v97_v17 = vld [vmem:[%s489_s1] sm:$0xff]  ;;  %v104_v23 = vld [vmem:[#allocation6 + $0x18] sm:$0xff]  ;;  %vm260_vm2 = vmpackc.low %vm60_vm0, %vm60_vm0 }
  0x2a   :  { %v103_v22 = vld [vmem:[#allocation6 + $0x10] sm:$0xff]  ;;  %v99_v29 = vld [vmem:[%s489_s1 + $0x10] sm:$0xff]  ;;  %v100_v30 = vld [vmem:[%s489_s1 + $0x18] sm:$0xff]  ;;  %v215_v46 = vsub.s32 0, %v214_v40 }
  0x2b   :  { %v113_v34 = vld [vmem:[#allocation3] sm:$0xff]  ;;  %v207_v36 = vld [vmem:[%s494_s6] sm:$0x1]  ;;  %s357_s6 = smov [#allocation8]  }
  0x2c   :  { %74 = vperm.xlu0 %275, %v63_v3   ;;  %84 = vperm.xlu1 %276, %v65_v4   ;;  %v208_v37 = vld [vmem:[%s495_s7] sm:$0x1]  ;;  %s226_s27 = sshll.u32 %s357_s6, 4  ;;  %s227_s27 = int_to_ptr.vmem [resolvable:$true] %s226_s27 }
  0x2d   :  { %v209_v39 = vmul.f32 %v208_v37, %v207_v36  ;;  %v206_v42 = vld [vmem:[%s493_s5] sm:$0x1]  ;;  %s321_s7 = scalar_lea.vmem %s227_s27, 128  ;;  %p326_p3 = scmp.lt.s32.totalorder %s227_s27, %s227_s27 }
  0x2e   :  { %p322_p2 = scmp.ne.s32.totalorder %s227_s27, %s321_s7  ;;  %p327_p4 = scmp.lt.s32.totalorder %s321_s7, %s321_s7 }
  0x2f   :  { %v114_v38 = vld [vmem:[#allocation2] sm:$0xff]  ;;  %v210_v45 = vadd.f32 %v209_v39, %v206_v42 }
  0x30   :  { %p328_p5 = por %p327_p4, %p326_p3 }
  0x31   :  { %v216_v47 = vrot.slane %v210_v45, %v215_v46 }
  0x32   :  { %p329_p6 = pnand %p328_p5, %p322_p2 }
  0xa7   :  { %v70_v8 = vpop.permute.xlu0 %69  ;;  %v80_v9 = vpop.permute.xlu1 %79 }
  0xa8   :  { %v93_v10 = vmul.f32 %v236_v7, %v70_v8  ;;  %v95_v19 = vmul.f32 %v236_v7, %v80_v9 }
  0xaa   :  { %v105_v15 = vmul.f32 %v101_v11, %v93_v10  ;;  %v107_v26 = vmul.f32 %v103_v22, %v95_v19 }
  0xab   :  { %v75_v13 = vpop.permute.xlu0 %74  ;;  %v85_v14 = vpop.permute.xlu1 %84 }
  0xac   :  { %v94_v16 = vmul.f32 %v236_v7, %v75_v13  ;;  %v96_v21 = vmul.f32 %v236_v7, %v85_v14  ;;  %v109_v24 = vadd.f32 %v105_v15, %v97_v17  ;;  %v111_v31 = vadd.f32 %v107_v26, %v99_v29 }
  0xae   :  { %v106_v20 = vmul.f32 %v102_v12, %v94_v16  ;;  %v108_v27 = vmul.f32 %v104_v23, %v96_v21 }
  0xb0   :  { %v110_v25 = vadd.f32 %v106_v20, %v98_v18  ;;  %v112_v32 = vadd.f32 %v108_v27, %v100_v30 }
  0xb2   :  { %v259_v28 = vpack.c.bf16 %v110_v25, %v109_v24  ;;  %v263_v33 = vpack.c.bf16 %v112_v32, %v111_v31 }
  0xb4   :  { %261 = vmatpush3.bf16.xpose.msk.msra.mxu0 %vm260_vm2, %v259_v28 }
  0xb5   :  { %262 = vmatprep.subr.bf16.mxu0 %v354_v5 }
  0xbc   :  { %265 = vmatpush3.bf16.xpose.msk.msra.mxu0 %vm260_vm2, %v263_v33 }
  0xc3   :  { %256 = vmatmul.mubr.msk.f32.vlgmr.msra.gmra.mrb[0].mxu0 %vm60_vm0, %v113_v34 }
 0x196   :  { %v197_v41 = vpop.f32.mrb[0].mxu0 }
 0x197   :  { %v201_v43 = vadd.f32 %v197_v41, %v114_v38  ;;  %v257_v44 = vpop.f32.mrb[1].mxu0 }
 0x199   :  { %202 = vst.msk [vmem:[#allocation2] sm:$0xff] %vm60_vm0, %v201_v43 }
 0x1a0   :  { %v211_v48 = vld [vmem:[#allocation2] sm:$0xff] }
 0x1a1   :  { %v218_v49 = vadd.f32 %v216_v47, %v211_v48 }
 0x1a3   :  { %219 = vst.msk [vmem:[#allocation8] sm:$0xff] %vm60_vm0, %v218_v49 }
 0x1a4   :  { %332 = shalt.err (!%p329_p6)
}
 0x1a5   :  { %s333_s29 = scalar_lea.hbm %s496_s8, 128 }
 0x1a6   :  { %p334_p7 = scmp.ne.s32.totalorder %s496_s8, %s333_s29  ;;  %p337_p8 = scmp.lt.u32.totalorder %s333_s29, %s496_s8 }
 0x1a8   :  { %p339_p9 = pnand %p337_p8, %p334_p7 }
 0x1aa   :  { %342 = shalt.err (!%p339_p9)
}
 0x1ab   :  { %229 = dma.vmem_to_hbm [thread:$0]  %s227_s27, 128, %s496_s8, [#allocation5]  }
 0x1ac   :  { %347 = dma.done.wait [#allocation5], 128  }
 0x1ad   :  { %348 = vsyncadd [#allocation5], 4294967168 }
 0x1ae   :  { %233 = vsyncpa [#allocation4], 1 }
 0x1af   :  { %234 = vsyncpa [#allocation7], 1 }
 0x1b0   :  { %235 = vsyncpa [#allocation5], 1 }

</bundles_post_ra>
